<compile_context>
chip_gen: v7x
topology: tpu7x:2x2x1
jax: 0.10.0
libtpu: 0.0.40
codegen_flags: <defaults>
</compile_context>

<pallas_src>
import jax
import jax.numpy as jnp
from jax.experimental import pallas as pl
from jax.experimental.pallas import tpu as pltpu

BN_EPS = 1e-5
LANES = 128


def _round_up(x, m):
    return ((x + m - 1) // m) * m


def _fused_linear_bn_kernel(cnt_ref, x_ref, w_ref, g_ref, b_ref, o_ref,
                            sum_ref, sumsq_ref):
    """Grid = (segment, phase, row-tile).

    segment: 0 = node path, 1 = edge path (params selected via BlockSpec index_map)
    phase 0: matmul tile -> accumulate per-feature sum / sum-of-squares (scratch)
    phase 1: recompute matmul tile (K <= 8, nearly free) -> normalize + affine -> store
    The Linear bias is intentionally dropped: BatchNorm's mean subtraction
    cancels it exactly, so the forward result is unchanged.
    """
    s = pl.program_id(0)        # segment
    p = pl.program_id(1)        # phase
    t = pl.program_id(2)        # row tile
    tm = x_ref.shape[1]

    n_valid = cnt_ref[s]        # true row count of this segment (SMEM scalar)

    # MXU matmul with f32 accumulation (no bias — cancelled by BN).
    y = jnp.dot(x_ref[0], w_ref[0], preferred_element_type=jnp.float32)

    row = t * tm + jax.lax.broadcasted_iota(jnp.int32, (tm, 1), 0)
    valid = row < n_valid       # mask zero-padded rows out of the statistics

    @pl.when(jnp.logical_and(p == 0, t == 0))
    def _init():
        sum_ref[...] = jnp.zeros_like(sum_ref)
        sumsq_ref[...] = jnp.zeros_like(sumsq_ref)

    @pl.when(p == 0)
    def _stats():
        ym = jnp.where(valid, y, 0.0)
        sum_ref[...] += jnp.sum(ym, axis=0, keepdims=True)
        sumsq_ref[...] += jnp.sum(ym * ym, axis=0, keepdims=True)

    @pl.when(p == 1)
    def _normalize():
        inv_n = 1.0 / n_valid.astype(jnp.float32)
        mean = sum_ref[...] * inv_n
        var = jnp.maximum(sumsq_ref[...] * inv_n - mean * mean, 0.0)
        inv_std = jax.lax.rsqrt(var + BN_EPS)
        scale = g_ref[0] * inv_std              # fold BN + affine into y*scale + shift
        shift = b_ref[0] - mean * scale
        o_ref[0] = (y * scale + shift).astype(o_ref.dtype)


def fused_linear_bn(x_node, x_edge, w_all, gamma_all, beta_all):
    """Both (Linear -> BatchNorm) paths in ONE pallas_call.

    Returns the padded (2, n_pad, dp) output; caller slices valid rows/columns.
    """
    n_node, n_edge = x_node.shape[0], x_edge.shape[0]
    d_in_max = w_all.shape[1]
    dp = w_all.shape[2]                         # lane-dense padded d_out (x128)

    max_n = max(n_node, n_edge)
    tm = min(256, _round_up(max_n, 8))          # row tile, multiple of 8 sublanes
    n_pad = _round_up(max_n, tm)
    n_tiles = n_pad // tm

    # Stack node/edge features into one zero-padded slab (common K, common rows).
    xs = jnp.zeros((2, n_pad, d_in_max), jnp.float32)
    xs = xs.at[0, :n_node, :x_node.shape[1]].set(x_node.astype(jnp.float32))
    xs = xs.at[1, :n_edge, :x_edge.shape[1]].set(x_edge.astype(jnp.float32))
    counts = jnp.array([n_node, n_edge], dtype=jnp.int32)

    return pl.pallas_call(
        _fused_linear_bn_kernel,
        out_shape=jax.ShapeDtypeStruct((2, n_pad, dp), jnp.float32),
        grid_spec=pltpu.PrefetchScalarGridSpec(
            num_scalar_prefetch=1,
            grid=(2, 2, n_tiles),               # (segment, phase, row tile)
            in_specs=[
                pl.BlockSpec((1, tm, d_in_max), lambda s, p, t, cnt: (s, t, 0)),
                pl.BlockSpec((1, d_in_max, dp), lambda s, p, t, cnt: (s, 0, 0)),
                pl.BlockSpec((1, 1, dp), lambda s, p, t, cnt: (s, 0, 0)),
                pl.BlockSpec((1, 1, dp), lambda s, p, t, cnt: (s, 0, 0)),
            ],
            # Lane-dense output (dp multiple of 128 -> unmasked stores).  During
            # phase 0 the block index is pinned to tile 0, so no never-written
            # buffer is flushed to HBM and each output block is written exactly once.
            out_specs=pl.BlockSpec((1, tm, dp),
                                   lambda s, p, t, cnt: (s, t * p, 0)),
            scratch_shapes=[pltpu.VMEM((1, dp), jnp.float32),
                            pltpu.VMEM((1, dp), jnp.float32)],
        ),
        compiler_params=pltpu.CompilerParams(
            # segment axis is independent -> can be split across v7x's 2 TCs;
            # phase/row-tile axes carry the stats accumulator -> arbitrary.
            dimension_semantics=("parallel", "arbitrary", "arbitrary")),
    )(counts, xs, w_all, gamma_all, beta_all)


class FeatureEncoderPallas:
    """JAX/Pallas port of FeatureEncoder.forward (applies children in order)."""

    def __init__(self, dim_in_node, dim_in_edge, gnn_dim_inner, gt_dim_edge, key):
        k = jax.random.split(key, 4)
        self.d_out_node = gnn_dim_inner
        self.d_out_edge = gt_dim_edge
        # Node encoder params (Linear dim_in_node -> gnn_dim_inner)
        self.node_w = (jax.random.normal(k[0], (dim_in_node, gnn_dim_inner),
                                         jnp.float32) / jnp.sqrt(dim_in_node))
        self.node_b = jax.random.normal(k[1], (1, gnn_dim_inner), jnp.float32) * 0.1
        self.node_gamma = jnp.ones((1, gnn_dim_inner), jnp.float32)
        self.node_beta = jnp.zeros((1, gnn_dim_inner), jnp.float32)
        # Edge encoder params (Linear dim_in_edge -> gt_dim_edge)
        self.edge_w = (jax.random.normal(k[2], (dim_in_edge, gt_dim_edge),
                                         jnp.float32) / jnp.sqrt(dim_in_edge))
        self.edge_b = jax.random.normal(k[3], (1, gt_dim_edge), jnp.float32) * 0.1
        self.edge_gamma = jnp.ones((1, gt_dim_edge), jnp.float32)
        self.edge_beta = jnp.zeros((1, gt_dim_edge), jnp.float32)

        # ---- Pack parameters ONCE into the fused-kernel layout ----------------
        # K padded to a common d_in, d_out padded to a lane-dense multiple of 128
        # (padded columns/rows are sliced off in __call__).  The Linear biases are
        # NOT packed: BN's mean subtraction cancels them exactly.
        self.d_in_max = max(dim_in_node, dim_in_edge)
        self.dp = _round_up(max(gnn_dim_inner, gt_dim_edge), LANES)
        w_all = jnp.zeros((2, self.d_in_max, self.dp), jnp.float32)
        w_all = w_all.at[0, :dim_in_node, :gnn_dim_inner].set(self.node_w)
        w_all = w_all.at[1, :dim_in_edge, :gt_dim_edge].set(self.edge_w)
        g_all = jnp.ones((2, 1, self.dp), jnp.float32)
        g_all = g_all.at[0, :, :gnn_dim_inner].set(self.node_gamma)
        g_all = g_all.at[1, :, :gt_dim_edge].set(self.edge_gamma)
        b_all = jnp.zeros((2, 1, self.dp), jnp.float32)
        b_all = b_all.at[0, :, :gnn_dim_inner].set(self.node_beta)
        b_all = b_all.at[1, :, :gt_dim_edge].set(self.edge_beta)
        self.w_all, self.g_all, self.b_all = w_all, g_all, b_all

    def __call__(self, batch):
        batch = dict(batch)
        x, e = batch["x"], batch["edge_attr"]
        # node_encoder -> node_encoder_bn  and  edge_encoder -> edge_encoder_bn,
        # both fused into a single Pallas launch.
        out = fused_linear_bn(x, e, self.w_all, self.g_all, self.b_all)
        batch["x"] = out[0, :x.shape[0], :self.d_out_node]
        batch["edge_attr"] = out[1, :e.shape[0], :self.d_out_edge]
        # TODO(synk): ExpanderEdgeFixer (Exphormer) builds expander-graph edge
        # indices (data-dependent graph construction); no Pallas equivalent here.
        return batch


def _reference(batch, enc):
    """Pure-JAX reference (includes the Linear bias, proving it is cancelled)."""
    def lin_bn(x, w, b, g, be):
        y = x.astype(jnp.float32) @ w + b
        m = jnp.mean(y, axis=0, keepdims=True)
        v = jnp.mean((y - m) ** 2, axis=0, keepdims=True)
        return (y - m) / jnp.sqrt(v + BN_EPS) * g + be
    return {
        "x": lin_bn(batch["x"], enc.node_w, enc.node_b, enc.node_gamma, enc.node_beta),
        "edge_attr": lin_bn(batch["edge_attr"], enc.edge_w, enc.edge_b,
                            enc.edge_gamma, enc.edge_beta),
    }


if __name__ == "__main__":
    key = jax.random.PRNGKey(0)
    k_x, k_e, k_p = jax.random.split(key, 3)

    num_nodes, dim_in_node = 16, 8     # node features
    num_edges, dim_in_edge = 24, 4     # edge features
    gnn_dim_inner = 32                 # cfg['gnn_dim_inner']
    gt_dim_edge = 32                   # cfg['gt_dim_edge'] (= gt_dim_hidden)

    batch = {
        "x": jax.random.normal(k_x, (num_nodes, dim_in_node), jnp.float32),
        "edge_attr": jax.random.normal(k_e, (num_edges, dim_in_edge), jnp.float32),
    }

    encoder = FeatureEncoderPallas(dim_in_node, dim_in_edge,
                                   gnn_dim_inner, gt_dim_edge, k_p)

    out = encoder(batch)
    jax.block_until_ready(out["x"])
    jax.block_until_ready(out["edge_attr"])

    ref = _reference(batch, encoder)
    assert out["x"].shape == (num_nodes, gnn_dim_inner)
    assert out["edge_attr"].shape == (num_edges, gt_dim_edge)
    assert jnp.allclose(out["x"], ref["x"], atol=1e-4, rtol=1e-4)
    assert jnp.allclose(out["edge_attr"], ref["edge_attr"], atol=1e-4, rtol=1e-4)

    print("KERNEL_OK")
</pallas_src>

<mosaic_0001>
module attributes {stable_mosaic.version = 11 : i64} {
  func.func @_fused_linear_bn_kernel(%arg0: i32, %arg1: i32, %arg2: i32, %arg3: memref<2xi32, #tpu.memory_space<smem>>, %arg4: memref<1x24x8xf32, #tpu.memory_space<vmem>>, %arg5: memref<1x8x128xf32, #tpu.memory_space<vmem>>, %arg6: memref<1x1x128xf32, #tpu.memory_space<vmem>>, %arg7: memref<1x1x128xf32, #tpu.memory_space<vmem>>, %arg8: memref<1x24x128xf32, #tpu.memory_space<vmem>>, %arg9: memref<1x128xf32, #tpu.memory_space<vmem>>, %arg10: memref<1x128xf32, #tpu.memory_space<vmem>>) attributes {dimension_semantics = [#tpu.dimension_semantics<parallel>, #tpu.dimension_semantics<arbitrary>, #tpu.dimension_semantics<arbitrary>], iteration_bounds = array<i64: 2, 2, 1>, scalar_prefetch = 1 : i64, scratch_operands = 2 : i64, tpu.core_type = #tpu.core_type<tc>, window_params = [{transform_indices = @transform_0, window_bounds = array<i64: 1, 24, 8>}, {transform_indices = @transform_1, window_bounds = array<i64: 1, 8, 128>}, {transform_indices = @transform_2, window_bounds = array<i64: 1, 1, 128>}, {transform_indices = @transform_3, window_bounds = array<i64: 1, 1, 128>}, {transform_indices = @transform_4, window_bounds = array<i64: 1, 24, 128>}]} {
    %0 = arith.index_cast %arg0 : i32 to index
    %1 = memref.load %arg3[%0] : memref<2xi32, #tpu.memory_space<smem>>
    %c0 = arith.constant 0 : index
    %c0_0 = arith.constant 0 : index
    %c0_1 = arith.constant 0 : index
    %2 = vector.load %arg4[%c0, %c0_0, %c0_1] : memref<1x24x8xf32, #tpu.memory_space<vmem>>, vector<1x24x8xf32>
    %3 = vector.shape_cast %2 : vector<1x24x8xf32> to vector<24x8xf32>
    %c0_2 = arith.constant 0 : index
    %c0_3 = arith.constant 0 : index
    %c0_4 = arith.constant 0 : index
    %4 = vector.load %arg5[%c0_2, %c0_3, %c0_4] : memref<1x8x128xf32, #tpu.memory_space<vmem>>, vector<1x8x128xf32>
    %5 = vector.shape_cast %4 : vector<1x8x128xf32> to vector<8x128xf32>
    %cst = arith.constant dense<0.000000e+00> : vector<24x128xf32>
    %6 = tpu.matmul %3, %5, %cst {dimension_numbers = #tpu.dot_dimension_numbers<[1], [0], [0], [1], [0, 0, 1, 1], [], []>} : vector<24x8xf32>, vector<8x128xf32>, vector<24x128xf32> -> vector<24x128xf32>
    %c24_i32 = arith.constant 24 : i32
    %7 = arith.muli %arg2, %c24_i32 : i32
    %8 = tpu.iota {dimensions = array<i32: 0>} : vector<24x1xi32>
    %9 = vector.broadcast %7 : i32 to vector<24x1xi32>
    %10 = arith.addi %9, %8 : vector<24x1xi32>
    %11 = vector.broadcast %1 : i32 to vector<24x1xi32>
    %12 = arith.cmpi slt, %10, %11 : vector<24x1xi32>
    %c0_i32 = arith.constant 0 : i32
    %13 = arith.cmpi eq, %arg1, %c0_i32 : i32
    %c0_i32_5 = arith.constant 0 : i32
    %14 = arith.cmpi eq, %arg2, %c0_i32_5 : i32
    %15 = arith.andi %13, %14 : i1
    %16 = arith.extui %15 : i1 to i32
    %c0_i32_6 = arith.constant 0 : i32
    %17 = arith.cmpi ne, %16, %c0_i32_6 : i32
    scf.if %17 {
      %cst_10 = arith.constant 0.000000e+00 : f32
      %24 = vector.broadcast %cst_10 : f32 to vector<1x128xf32>
      %c0_11 = arith.constant 0 : index
      %c0_12 = arith.constant 0 : index
      %25 = vector.load %arg9[%c0_11, %c0_12] : memref<1x128xf32, #tpu.memory_space<vmem>>, vector<1x128xf32>
      tpu.vector_store %arg9[%c0_11, %c0_12], %24 {strides = array<i32>} : memref<1x128xf32, #tpu.memory_space<vmem>>, vector<1x128xf32>,
      %cst_13 = arith.constant 0.000000e+00 : f32
      %26 = vector.broadcast %cst_13 : f32 to vector<1x128xf32>
      %c0_14 = arith.constant 0 : index
      %c0_15 = arith.constant 0 : index
      %27 = vector.load %arg10[%c0_14, %c0_15] : memref<1x128xf32, #tpu.memory_space<vmem>>, vector<1x128xf32>
      tpu.vector_store %arg10[%c0_14, %c0_15], %26 {strides = array<i32>} : memref<1x128xf32, #tpu.memory_space<vmem>>, vector<1x128xf32>,
    } else {
    }
    %c0_i32_7 = arith.constant 0 : i32
    %18 = arith.cmpi eq, %arg1, %c0_i32_7 : i32
    %19 = arith.extui %18 : i1 to i32
    %c0_i32_8 = arith.constant 0 : i32
    %20 = arith.cmpi ne, %19, %c0_i32_8 : i32
    scf.if %20 {
      %cst_10 = arith.constant 0.000000e+00 : f32
      %24 = vector.shape_cast %12 : vector<24x1xi1> to vector<24x1xi1>
      %25 = vector.broadcast %24 : vector<24x1xi1> to vector<24x128xi1>
      %26 = vector.broadcast %cst_10 : f32 to vector<24x128xf32>
      %27 = arith.select %25, %6, %26 : vector<24x128xi1>, vector<24x128xf32>
      %c0_11 = arith.constant 0 : index
      %c0_12 = arith.constant 0 : index
      %28 = vector.load %arg9[%c0_11, %c0_12] : memref<1x128xf32, #tpu.memory_space<vmem>>, vector<1x128xf32>
      %cst_13 = arith.constant dense<0.000000e+00> : vector<128xf32>
      %29 = vector.multi_reduction <add>, %27, %cst_13 [0] : vector<24x128xf32> to vector<128xf32>
      %30 = vector.shape_cast %29 : vector<128xf32> to vector<1x128xf32>
      %31 = arith.addf %28, %30 : vector<1x128xf32>
      %c0_14 = arith.constant 0 : index
      %c0_15 = arith.constant 0 : index
      %32 = vector.load %arg9[%c0_14, %c0_15] : memref<1x128xf32, #tpu.memory_space<vmem>>, vector<1x128xf32>
      tpu.vector_store %arg9[%c0_14, %c0_15], %31 {strides = array<i32>} : memref<1x128xf32, #tpu.memory_space<vmem>>, vector<1x128xf32>,
      %c0_16 = arith.constant 0 : index
      %c0_17 = arith.constant 0 : index
      %33 = vector.load %arg10[%c0_16, %c0_17] : memref<1x128xf32, #tpu.memory_space<vmem>>, vector<1x128xf32>
      %34 = arith.mulf %27, %27 : vector<24x128xf32>
      %cst_18 = arith.constant dense<0.000000e+00> : vector<128xf32>
      %35 = vector.multi_reduction <add>, %34, %cst_18 [0] : vector<24x128xf32> to vector<128xf32>
      %36 = vector.shape_cast %35 : vector<128xf32> to vector<1x128xf32>
      %37 = arith.addf %33, %36 : vector<1x128xf32>
      %c0_19 = arith.constant 0 : index
      %c0_20 = arith.constant 0 : index
      %38 = vector.load %arg10[%c0_19, %c0_20] : memref<1x128xf32, #tpu.memory_space<vmem>>, vector<1x128xf32>
      tpu.vector_store %arg10[%c0_19, %c0_20], %37 {strides = array<i32>} : memref<1x128xf32, #tpu.memory_space<vmem>>, vector<1x128xf32>,
    } else {
    }
    %c1_i32 = arith.constant 1 : i32
    %21 = arith.cmpi eq, %arg1, %c1_i32 : i32
    %22 = arith.extui %21 : i1 to i32
    %c0_i32_9 = arith.constant 0 : i32
    %23 = arith.cmpi ne, %22, %c0_i32_9 : i32
    scf.if %23 {
      %24 = arith.sitofp %1 : i32 to f32
      %cst_10 = arith.constant 1.000000e+00 : f32
      %25 = arith.divf %cst_10, %24 : f32
      %c0_11 = arith.constant 0 : index
      %c0_12 = arith.constant 0 : index
      %26 = vector.load %arg9[%c0_11, %c0_12] : memref<1x128xf32, #tpu.memory_space<vmem>>, vector<1x128xf32>
      %27 = vector.broadcast %25 : f32 to vector<1x128xf32>
      %28 = arith.mulf %26, %27 : vector<1x128xf32>
      %c0_13 = arith.constant 0 : index
      %c0_14 = arith.constant 0 : index
      %29 = vector.load %arg10[%c0_13, %c0_14] : memref<1x128xf32, #tpu.memory_space<vmem>>, vector<1x128xf32>
      %30 = vector.broadcast %25 : f32 to vector<1x128xf32>
      %31 = arith.mulf %29, %30 : vector<1x128xf32>
      %32 = arith.mulf %28, %28 : vector<1x128xf32>
      %33 = arith.subf %31, %32 : vector<1x128xf32>
      %cst_15 = arith.constant 0.000000e+00 : f32
      %34 = vector.broadcast %cst_15 : f32 to vector<1x128xf32>
      %35 = arith.maximumf %33, %34 : vector<1x128xf32>
      %cst_16 = arith.constant 9.99999974E-6 : f32
      %36 = vector.broadcast %cst_16 : f32 to vector<1x128xf32>
      %37 = arith.addf %35, %36 : vector<1x128xf32>
      %38 = math.rsqrt %37 : vector<1x128xf32>
      %c0_17 = arith.constant 0 : index
      %c0_18 = arith.constant 0 : index
      %c0_19 = arith.constant 0 : index
      %39 = vector.load %arg6[%c0_17, %c0_18, %c0_19] : memref<1x1x128xf32, #tpu.memory_space<vmem>>, vector<1x1x128xf32>
      %40 = vector.shape_cast %39 : vector<1x1x128xf32> to vector<1x128xf32>
      %41 = arith.mulf %40, %38 : vector<1x128xf32>
      %c0_20 = arith.constant 0 : index
      %c0_21 = arith.constant 0 : index
      %c0_22 = arith.constant 0 : index
      %42 = vector.load %arg7[%c0_20, %c0_21, %c0_22] : memref<1x1x128xf32, #tpu.memory_space<vmem>>, vector<1x1x128xf32>
      %43 = vector.shape_cast %42 : vector<1x1x128xf32> to vector<1x128xf32>
      %44 = arith.mulf %28, %41 : vector<1x128xf32>
      %45 = arith.subf %43, %44 : vector<1x128xf32>
      %46 = vector.broadcast %41 : vector<1x128xf32> to vector<24x128xf32>
      %47 = arith.mulf %6, %46 : vector<24x128xf32>
      %48 = vector.broadcast %45 : vector<1x128xf32> to vector<24x128xf32>
      %49 = arith.addf %47, %48 : vector<24x128xf32>
      %c0_23 = arith.constant 0 : index
      %c0_24 = arith.constant 0 : index
      %c0_25 = arith.constant 0 : index
      %50 = vector.load %arg8[%c0_23, %c0_24, %c0_25] : memref<1x24x128xf32, #tpu.memory_space<vmem>>, vector<1x24x128xf32>
      %51 = vector.shape_cast %50 : vector<1x24x128xf32> to vector<24x128xf32>
      %52 = vector.shape_cast %49 : vector<24x128xf32> to vector<1x24x128xf32>
      tpu.vector_store %arg8[%c0_23, %c0_24, %c0_25], %52 {strides = array<i32>} : memref<1x24x128xf32, #tpu.memory_space<vmem>>, vector<1x24x128xf32>,
    } else {
    }
    return
  }
  func.func @transform_0(%arg0: i32, %arg1: i32, %arg2: i32, %arg3: memref<2xi32, #tpu.memory_space<smem>>) -> (i32, i32, i32) {
    %c0_i32 = arith.constant 0 : i32
    %c0_i32_0 = arith.constant 0 : i32
    return %arg0, %arg2, %c0_i32 : i32, i32, i32
  }
  func.func @transform_1(%arg0: i32, %arg1: i32, %arg2: i32, %arg3: memref<2xi32, #tpu.memory_space<smem>>) -> (i32, i32, i32) {
    %c0_i32 = arith.constant 0 : i32
    %c0_i32_0 = arith.constant 0 : i32
    %c0_i32_1 = arith.constant 0 : i32
    return %arg0, %c0_i32, %c0_i32_0 : i32, i32, i32
  }
  func.func @transform_2(%arg0: i32, %arg1: i32, %arg2: i32, %arg3: memref<2xi32, #tpu.memory_space<smem>>) -> (i32, i32, i32) {
    %c0_i32 = arith.constant 0 : i32
    %c0_i32_0 = arith.constant 0 : i32
    %c0_i32_1 = arith.constant 0 : i32
    return %arg0, %c0_i32, %c0_i32_0 : i32, i32, i32
  }
  func.func @transform_3(%arg0: i32, %arg1: i32, %arg2: i32, %arg3: memref<2xi32, #tpu.memory_space<smem>>) -> (i32, i32, i32) {
    %c0_i32 = arith.constant 0 : i32
    %c0_i32_0 = arith.constant 0 : i32
    %c0_i32_1 = arith.constant 0 : i32
    return %arg0, %c0_i32, %c0_i32_0 : i32, i32, i32
  }
  func.func @transform_4(%arg0: i32, %arg1: i32, %arg2: i32, %arg3: memref<2xi32, #tpu.memory_space<smem>>) -> (i32, i32, i32) {
    %0 = arith.muli %arg2, %arg1 : i32
    %c0_i32 = arith.constant 0 : i32
    %c0_i32_0 = arith.constant 0 : i32
    return %arg0, %0, %c0_i32 : i32, i32, i32
  }
}

</mosaic_0001>

<bundles_post_ra>
// kernel: tpu_custom_call.1
= control target key start
LH: loop header
LB: loop body
LE: loop exit
PB: predicated region body
PF: predicated region fallthrough
CT: control target
= control target key end

     0   :  { %s1094_s0 = inlined_call_operand.vmem [shape: s32[2], index: 0, kind: input, shape index: {}]   ;;  %s1095_s1 = inlined_call_operand.vmem [shape: f32[2,24,8], index: 1, kind: input, shape index: {}]   ;;  %s1096_s2 = inlined_call_operand.vmem [shape: f32[2,8,128], index: 2, kind: input, shape index: {}]   ;;  %s1097_s3 = inlined_call_operand.vmem [shape: f32[2,1,128], index: 3, kind: input, shape index: {}]   ;;  %s1098_s4 = inlined_call_operand.vmem [shape: f32[2,1,128], index: 4, kind: input, shape index: {}]   ;;  %s1099_s5 = inlined_call_operand.hbm [shape: f32[2,24,128], index: 5, kind: output, shape index: {}]  }
   0x1   :  { %s10_s20 = sshll.u32 %s1094_s0, 4  ;;  %s11_s20 = int_to_ptr.vmem [resolvable:$true] %s10_s20 }
   0x2   :  { %s738_s21 = scalar_lea.vmem %s11_s20, 16  ;;  %p743_p1 = scmp.lt.s32.totalorder %s11_s20, %s11_s20 }
   0x3   :  { %p739_p0 = scmp.ne.s32.totalorder %s11_s20, %s738_s21  ;;  %p744_p2 = scmp.lt.s32.totalorder %s738_s21, %s738_s21 }
   0x5   :  { %p745_p3 = por %p744_p2, %p743_p1 }
   0x7   :  { %p746_p4 = pnand %p745_p3, %p739_p0 }
   0x9   :  { %749 = shalt.err (!%p746_p4)  }
   0xa   :  { %s848_s22 = smov [#allocation5]  }
   0xb   :  { %13 = dma.vmem_to_smem %s11_s20, 16, %s848_s22, [#allocation4] }
   0xc   :  { %810 = dma.done.wait [#allocation4], 16 }
   0xd   :  { %811 = vsyncadd [#allocation4], 4294967280 }
   0xe   :  { %15 = sfence }
   0xf   :  { %16 = vsyncpa [#allocation7], 0 }
  0x10   :  { %18 = vsyncpa [#allocation7 + $0x1], 0  ;;  %s888_s23 = smov 0   ;;  %s890_s24 = smov 0  }
  0x11   :  { %s892_s0 = smov 0   ;;  %s894_s25 = smov 0  }
  0x12   :  { %s896_s26 = smov 0   ;;  %s898_s27 = smov 0  }
  0x13   :  { %s900_s28 = smov 0   ;;  %s902_s29 = smov 0  }
  0x14 LB: > { %1103 = sst [smem:[#allocation10_spill]] %s842_s28  ;;  %s618_s30 = sadd.s32 4294967295, %s846_s29   ;;  %s846_s29 = sphi %s902_s29, %s24_s29   ;;  %s842_s28 = sphi %s900_s28, %s1111_s28   ;;  %s838_s27 = sphi %s898_s27, %s1116_s27   ;;  %s834_s26 = sphi %s896_s26, %s1109_s26   ;;  %s830_s25 = sphi %s894_s25, %s1115_s25   ;;  %s826_s0 = sphi %s892_s0, %s1114_s0   ;;  %s822_s24 = sphi %s890_s24, %s1113_s24   ;;  %s818_s23 = sphi %s888_s23, %s1112_s23  }
  0x15   : > { %s619_s6 = sadd.s32 4294967294, %s846_s29   ;;  %s39_s7 = sadd.s32 1, %s838_s27 }
  0x16   : > { %p41_p5 = scmp.ge.s32.totalorder %s39_s7, 2  ;;  %s43_s8 = sadd.s32 1, %s842_s28 }
  0x17   : > { %p170_p6 = scmp.ne.s32.totalorder %s826_s0, %s822_s24  ;;  %p171_p7 = scmp.eq.s32.totalorder %s618_s30, 3 }
  0x18   : > { %s1118_s7 = smov (%p41_p5, %s39_s7), 0  ;;  %s1120_s8 = smov (!%p41_p5, %s43_s8), %s842_s28 }
  0x19   : > { %1104 = sst [smem:[#allocation11_spill]] %s1118_s7  ;;  %p937_p8 = por %p171_p7, %p170_p6 }
  0x1a   : > { %p176_p9 = scmp.ne.s32.totalorder %s822_s24, %s818_s23  ;;  %p45_p10 = scmp.ge.s32.totalorder %s1120_s8, 2 }
  0x1b   : > { %p177_p11 = scmp.eq.s32.totalorder %s619_s6, 3  ;;  %p622_p12 = scmp.ge.s32.totalorder %s846_s29, 1 }
  0x1c   : > { %p227_p13 = scmp.lt.s32.totalorder %s846_s29, 5  ;;  %s1122_s8 = smov (%p45_p10, %s1120_s8), 0 }
  0x1d   : > { %1106 = sst [smem:[#allocation12_spill]] %s1122_s8  ;;  %p947_p0 = por %p177_p11, %p176_p9 }
  0x1e   : > { %p228_p1 = pnand %p622_p12, %p227_p13  ;;  %s155_s11 = ssub.s32 %s842_s28, %s1122_s8 }
  0x1f   : > { %s160_s12 = sadd.s32 1, %s826_s0  ;;  %p158_p2 = scmp.eq.s32.totalorder %s155_s11, 0  ;;  %v849_v0 = vmov (!%p228_p1), 0.0   ;;  %vm850_vm0 = vmmov (!%p228_p1), 0   ;;  %vm294_vm1 = vcmask (!%p228_p1), 64512   ;;  %v385_v5 = vlaneseq (!%p228_p1) }
  0x20   : > { %231 = sbr.rel (%p228_p1) target bundleno = 412 (0x19c), region = 36  ;;  %p268_p3 = scmp.lt.s32.totalorder (!%p228_p1), %s834_s26, 1  ;;  %650 = vmatprep.subr.mxu1 (!%p228_p1), %v849_v0  ;;  %644 = vmatprep.mubr.msk.f32.mxu1 (!%p228_p1), %vm850_vm0, %v849_v0 }
  0x21   : > { %s955_s13 = scalar_select %p158_p2, %s826_s0, %s160_s12  }
  0x22   : > { %s1100_s14 = sand.u32 (!%p228_p1), 1, %s822_s24   ;;  %639 = vmatprep.subr.mxu0 (!%p228_p1), %v849_v0  ;;  %641 = vmatprep.mubr.msk.f32.mxu0 (!%p228_p1), %vm850_vm0, %v849_v0  ;;  %v988_v6 = vshrl.u32 (!%p228_p1), %v385_v5, 7  ;;  %p397_p4 = scmp.eq.s32.totalorder (!%p228_p1), %s830_s25, 0 }
  0x23   : > { %s962_s15 = smul.u32 (!%p228_p1), 24, %s1100_s14 }
  0x24   : > { %v387_v7 = vadd.s32 (!%p228_p1), 8, %v988_v6  ;;  %v388_v8 = vadd.s32 (!%p228_p1), 16, %v988_v6 }
  0x27   : > { %s965_s16 = scalar_select %p268_p3, %s834_s26, 1 }
  0x28   : > { %v851_v16 = vmov (%p397_p4), 0.0  }
  0x29   : > { %s624_s17 = sshll.u32 %s965_s16, 3  ;;  %s283_s20 = scalar_lea.vmem %s1097_s3, %s965_s16  ;;  %403 = vst [vmem:[#allocation2] sm:$0x1] (%p397_p4), %v851_v16  ;;  %404 = vst [vmem:[#allocation3] sm:$0x1] (%p397_p4), %v851_v16 }
  0x2a   : > { %s280_s30 = scalar_lea.vmem %s1096_s2, %s624_s17  ;;  %s286_s12 = scalar_lea.vmem %s1098_s4, %s965_s16 }
  0x2b   : > { %v293_v1 = vld [vmem:[%s280_s30] sm:$0xff]  ;;  %s653_s14 = smul.u32 24, %s965_s16  ;;  %s986_s17 = sld [smem:[#allocation5 + %s834_s26]] }
  0x2c   : > { %651 = vmatpush3.msra.mxu1 %v293_v1  ;;  %640 = vmatpush3.msra.mxu0 %v293_v1 }
  0x2d   : > { %s275_s28 = scalar_lea.vmem %s1095_s1, %s653_s14 }
  0x2e   : > { %v291_v2 = vld [vmem:[%s275_s28 + $0x8] sm:$0xff]  ;;  %v290_v3 = vld [vmem:[%s275_s28] sm:$0xff]  ;;  %v292_v4 = vld [vmem:[%s275_s28 + $0x10] sm:$0xff]  ;;  %s1002_s28 = scalar_lea.vmem [#allocation6], %s962_s15 }
  0x2f   : > { %645 = vmatmul.mubr.msk.f32.vlgmr.msra.gmra.mrb[0].mxu1 %vm294_vm1, %v291_v2  ;;  %642 = vmatmul.mubr.msk.f32.vlgmr.msra.gmra.mrb[0].mxu0 %vm294_vm1, %v290_v3 }
  0x30   : > { %647 = vmatprep.mubr.msk.f32.mxu1 %vm850_vm0, %v849_v0 }
  0x31   : > { %v393_v9 = vstv %s986_s17 }
  0x32   : > { %vm394_vm2 = vcmp.lt.s32.totalorder %v988_v6, %v393_v9  ;;  %vm395_vm3 = vcmp.lt.s32.totalorder %v387_v7, %v393_v9  ;;  %vm396_vm4 = vcmp.lt.s32.totalorder %v388_v8, %v393_v9 }
  0x33   : > { %648 = vmatmul.mubr.msk.f32.gmra.mrb[2].mxu1 %vm294_vm1, %v292_v4 }
 0x101   : > { %402 = sbr.rel (!%p397_p4) target bundleno = 264 (0x108), region = 40 }
 0x102   : > { %v995_v10 = vpop.f32.mrb[0].mxu1  ;;  %v997_v11 = vpop.f32.mrb[0].mxu0 }
 0x103   : > { %v646_v12 = vpop.f32.mrb[1].mxu1  ;;  %v643_v13 = vpop.f32.mrb[1].mxu0 }
 0x106   : > { %v999_v14 = vpop.f32.mrb[2].mxu1 }
 0x107   : > { %v649_v15 = vpop.f32.mrb[3].mxu1 }
 0x108 PF: > { %p629_p5 = scmp.ne.s32.totalorder %s830_s25, 0 }
 0x109   : > { %v414_v17 = vsel (!%p629_p5), %vm394_vm2, %v997_v11, 0.0  ;;  %v415_v18 = vsel (!%p629_p5), %vm395_vm3, %v995_v10, 0.0  ;;  %v416_v19 = vsel (!%p629_p5), %vm396_vm4, %v999_v14, 0.0  ;;  %v417_v36 = vld [vmem:[#allocation2] sm:$0x1] (!%p629_p5) }
 0x10a   : > { %407 = sbr.rel (%p629_p5) target bundleno = 287 (0x11f), region = 44  ;;  %v418_v20 = vadd.f32 (!%p629_p5), %v415_v18, %v414_v17  ;;  %v429_v21 = vmul.f32 (!%p629_p5), %v414_v17, %v414_v17  ;;  %v430_v22 = vmul.f32 (!%p629_p5), %v415_v18, %v415_v18  ;;  %v431_v23 = vmul.f32 (!%p629_p5), %v416_v19, %v416_v19  ;;  %v428_v39 = vld [vmem:[#allocation3] sm:$0x1] (!%p629_p5) }
 0x10c   : > { %v419_v24 = vadd.f32 (!%p629_p5), %v418_v20, %v416_v19  ;;  %v432_v25 = vadd.f32 (!%p629_p5), %v430_v22, %v429_v21 }
 0x10e   : > { %v420_v26 = vrot.slane (!%p629_p5), %v419_v24, 4  ;;  %v433_v27 = vadd.f32 (!%p629_p5), %v432_v25, %v431_v23 }
 0x110   : > { %v421_v28 = vadd.f32 (!%p629_p5), %v420_v26, %v419_v24  ;;  %v434_v29 = vrot.slane (!%p629_p5), %v433_v27, 4 }
 0x112   : > { %v422_v30 = vrot.slane %v421_v28, 2  ;;  %v435_v31 = vadd.f32 %v434_v29, %v433_v27 }
 0x114   : > { %v423_v32 = vadd.f32 %v422_v30, %v421_v28  ;;  %v436_v33 = vrot.slane %v435_v31, 2 }
 0x116   : > { %v424_v34 = vrot.slane %v423_v32, 1  ;;  %v437_v35 = vadd.f32 %v436_v33, %v435_v31 }
 0x118   : > { %v425_v37 = vadd.f32 %v424_v34, %v423_v32  ;;  %v438_v38 = vrot.slane %v437_v35, 1 }
 0x11a   : > { %v426_v40 = vadd.f32 %v425_v37, %v417_v36  ;;  %v439_v41 = vadd.f32 %v438_v38, %v437_v35 }
 0x11c   : > { %427 = vst [vmem:[#allocation2] sm:$0x1] %v426_v40  ;;  %v440_v42 = vadd.f32 %v439_v41, %v428_v39 }
 0x11e   : > { %441 = vst [vmem:[#allocation3] sm:$0x1] %v440_v42 }
 0x11f PF: > { %p630_p6 = scmp.ne.s32.totalorder %s830_s25, 1 }
 0x120   : > { %s446_s7 = scvt.s32.f32 (!%p630_p6), %s986_s17  ;;  %v460_v54 = vld [vmem:[%s283_s20] sm:$0x1] (!%p630_p6)  ;;  %v468_v55 = vsub.s32 (!%p630_p6), 0, %v988_v6 }
 0x121   : > { %445 = sbr.rel (%p630_p6) target bundleno = 386 (0x182), region = 48  ;;  %v462_v58 = vld [vmem:[%s286_s12] sm:$0x1] (!%p630_p6) }
 0x122   : > { %v447_v43 = vstv (!%p630_p6), %s446_s7 }
 0x123   : > { %734 = vrcp.f32 (!%p630_p6), %v447_v43  ;;  %v450_v45 = vld [vmem:[#allocation2] sm:$0x1] (!%p630_p6) }
 0x125   : > { %v453_v47 = vld [vmem:[#allocation3] sm:$0x1] (!%p630_p6) }
 0x12d   : > { %v735_v44 = vpop.eup %734 }
 0x12e   : > { %654 = vpush %v735_v44 }
 0x15f   : > { %s655_s8 = spop %654 }
 0x160   : > { %v451_v46 = vstv %s655_s8 }
 0x161   : > { %v452_v48 = vmul.f32 %v451_v46, %v450_v45  ;;  %v454_v49 = vmul.f32 %v453_v47, %v451_v46 }
 0x163   : > { %v455_v50 = vmul.f32 %v452_v48, %v452_v48 }
 0x165   : > { %v456_v51 = vsub.f32 %v454_v49, %v455_v50 }
 0x167   : > { %v457_v52 = vmax.f32 %v456_v51, 0.0 }
 0x169   : > { %v458_v53 = vadd.f32 1e-05, %v457_v52 }
 0x16b   : > { %736 = vrsqrt.f32 %v458_v53 }
 0x175   : > { %v737_v56 = vpop.eup %736 }
 0x176   : > { %v461_v57 = vmul.f32 %v737_v56, %v460_v54 }
 0x178   : > { %v463_v59 = vmul.f32 %v461_v57, %v452_v48  ;;  %v469_v60 = vrot.slane %v461_v57, %v468_v55 }
 0x17a   : > { %v464_v61 = vsub.f32 %v462_v58, %v463_v59  ;;  %v471_v62 = vmul.f32 %v469_v60, %v997_v11  ;;  %v472_v63 = vmul.f32 %v469_v60, %v995_v10  ;;  %v473_v0 = vmul.f32 %v469_v60, %v999_v14 }
 0x17c   : > { %v478_v1 = vrot.slane %v464_v61, %v468_v55 }
 0x17e   : > { %v480_v2 = vadd.f32 %v478_v1, %v471_v62  ;;  %v481_v3 = vadd.f32 %v478_v1, %v472_v63  ;;  %v482_v4 = vadd.f32 %v478_v1, %v473_v0 }
 0x180   : > { %483 = vst [vmem:[%s1002_s28] sm:$0xff] %v480_v2  ;;  %484 = vst [vmem:[%s1002_s28 + $0x8] sm:$0xff] %v481_v3 }
 0x181   : > { %485 = vst [vmem:[%s1002_s28 + $0x10] sm:$0xff] %v482_v4 }
 0x182 PF: > { %s656_s16 = smul.u32 384, %s834_s26  ;;  %s503_s19 = sshll.u32 %s1002_s28, 4  ;;  %s1038_s19 = int_to_ptr.vmem [resolvable:$true] %s503_s19 }
 0x183   : > { %s1108_s30 = sand.u32 1, %s822_s24   ;;  %s750_s11 = scalar_lea.vmem %s1038_s19, 384 }
 0x184   : > { %s1036_s22 = scalar_lea.hbm %s1099_s5, %s656_s16  ;;  %s1042_s6 = scalar_lea.sflag [#allocation7], %s1108_s30 }
 0x185   : > { %p751_p7 = scmp.ne.s32.totalorder %s1038_s19, %s750_s11  ;;  %s852_s26 = smov [#allocation6]  }
 0x186   : > { %s754_s12 = sshll.u32 %s852_s26, 4  ;;  %s755_s12 = int_to_ptr.vmem [resolvable:$false] %s754_s12 }
 0x187   : > { %p752_p9 = pnand %p751_p7, %p937_p8  ;;  %s756_s17 = scalar_lea.vmem %s755_s12, 768 }
 0x188   : > { %p757_p11 = scmp.lt.s32.totalorder %s1038_s19, %s755_s12  ;;  %p758_p12 = scmp.lt.s32.totalorder %s756_s17, %s750_s11 }
 0x189   : > { %p753_p10 = pneg %p752_p9 }
 0x18a   : > { %p759_p13 = por %p758_p12, %p757_p11 }
 0x18c   : > { %p760_p1 = pnand %p759_p13, %p753_p10 }
 0x18e   : > { %763 = shalt.err (!%p760_p1)
}
 0x18f   : > { %s764_s28 = scalar_lea.hbm %s1036_s22, 384  ;;  %s768_s25 = scalar_lea.hbm %s1099_s5, 768 }
 0x190   : > { %p765_p2 = scmp.ne.s32.totalorder %s1036_s22, %s764_s28  ;;  %p769_p5 = scmp.lt.u32.totalorder %s1036_s22, %s1099_s5 }
 0x191   : > { %p770_p6 = scmp.lt.u32.totalorder %s768_s25, %s764_s28  ;;  %p772_p9 = scmp.lt.u32.totalorder %s764_s28, %s1036_s22 }
 0x192   : > { %p766_p3 = pnand %p765_p2, %p937_p8 }
 0x193   : > { %p771_p7 = por %p770_p6, %p769_p5 }
 0x194   : > { %p767_p4 = pneg %p766_p3 }
 0x195   : > { %p773_p10 = por %p772_p9, %p771_p7 }
 0x197   : > { %p774_p11 = pnand %p773_p10, %p767_p4 }
 0x199   : > { %777 = shalt.err (!%p774_p11)
}
 0x19a   : > { %s853_s18 = smov 128   ;;  %s854_s16 = smov 8  }
 0x19b   : > { %657 = dma.vmem_to_hbm [thread:$0]  (%p937_p8), %s1038_s19, 384, %s1036_s22, %s1042_s6, %s853_s18, %s853_s18, %s854_s16  }
 0x19c PF: > { %p663_p12 = scmp.ge.s32.totalorder %s846_s29, 2  ;;  %s518_s20 = sand.u32 1, %s818_s23  }
 0x19d   : > { %s519_s21 = scalar_lea.sflag [#allocation7], %s518_s20 }
 0x19e   : > { %p660_p13 = pnand %p663_p12, %p947_p0 }
 0x1a0   : > { %813 = dma.done.wait (!%p660_p13), %s519_s21, 384  }
 0x1a1   : > { %815 = vsyncadd (!%p660_p13), %s519_s21, 4294966912  ;;  %s24_s29 = sadd.s32 1, %s846_s29   ;;  %s1109_s26 = sld [smem:[#allocation10_spill]] }
 0x1a2   : > { %p21_p1 = scmp.ge.s32.totalorder %s24_s29, 6   ;;  %s1110_s9 = sld [smem:[#allocation11_spill]] }
 0x1a3   : > { %s1111_s28 = sld [smem:[#allocation12_spill]]  ;;  %s1112_s23 = smov %s822_s24 }
 0x1a4   : > { %s1113_s24 = smov %s826_s0  ;;  %s1114_s0 = smov %s955_s13 }
 0x1a5   : > { %s1115_s25 = smov %s838_s27  ;;  %23 = sbr.rel (!%p21_p1) target bundleno = 20 (0x14), region = 92 }
 0x1a8   : > { %s1116_s27 = smov %s1110_s9 }
 0x1ac   :  { %524 = vsyncpa [#allocation7], 1 }
 0x1ad   :  { %526 = vsyncpa [#allocation7 + $0x1], 1 }

</bundles_post_ra>
